<compile_context>
chip_gen: v7x
topology: tpu7x:2x2x1
jax: 0.10.0
libtpu: 0.0.40
codegen_flags: <defaults>
</compile_context>

<pallas_src>
import jax
import jax.numpy as jnp
from jax import lax
from jax.experimental import pallas as pl
from jax.experimental.pallas import tpu as pltpu


# ---------------------------------------------------------------------------
# Hardware-aware tiling helpers
# ---------------------------------------------------------------------------

def _round_up(n, m):
    return ((n + m - 1) // m) * m


def _tpu_vmem_capacity_bytes():
    """Physical VMEM per core (generation aware); conservative default = v7x."""
    try:
        cap = int(pltpu.get_tpu_info().vmem_capacity_bytes)
        if cap > 0:
            return cap
    except Exception:
        pass
    return 64 * 1024 * 1024


def _num_tensorcores():
    """TensorCores that share the grid under dimension_semantics='parallel'."""
    try:
        dev = jax.devices()[0]
        v = getattr(dev, "num_cores", None)
        if isinstance(v, int) and 0 < v <= 16:
            return v
        kind = str(getattr(dev, "device_kind", "")).lower()
        if ("v4" in kind) or ("v5p" in kind) or ("7" in kind):
            return 2
    except Exception:
        pass
    return 1


def _pick_tiling(B, T, D, itemsize, t_block=None):
    """Choose (batch_tile, t_tile, padded_T, num_t_steps, vmem_limit_bytes)."""
    vmem_cap = _tpu_vmem_capacity_bytes()
    # One x block is double-buffered and the kernel keeps roughly two more
    # x-sized f32 temporaries live (cast / wx), so cap a single block at about
    # 1/10 of physical VMEM: ~6 MiB on v7x, ~12 MiB on v5e/v6e.
    block_budget = vmem_cap // 10
    vmem_limit = min(vmem_cap // 2, 64 * 1024 * 1024)

    rows_cap = max(8, (block_budget // (itemsize * max(D, 1))) // 8 * 8)
    # HBM-bandwidth-bound kernel: target ~512-1024 rows per grid step (past the
    # measured HBM-roofline knee; amortizes the ~0.35us per-step overhead).
    rows_target = min(rows_cap, 1024)
    num_cores = _num_tensorcores()

    t_pad8 = _round_up(T, 8)
    if t_block is not None:
        tb = min(max(_round_up(t_block, 8), 8), t_pad8)
    elif t_pad8 <= rows_cap:
        tb = t_pad8                      # whole sequence in one block
    else:
        tb = rows_cap                    # long sequence: tile T (multiple of 8)
    t_pad = _round_up(T, tb)
    n_t = t_pad // tb

    divs = [d for d in range(1, B + 1) if B % d == 0]
    fit = [d for d in divs if d * tb <= rows_cap] or [1]
    bt = max([d for d in fit if d * tb <= max(rows_target, tb)] or [fit[0]])
    # Megacore (2-TC) parts shard the parallel batch axis: keep >= num_cores
    # grid steps unless that would starve the per-step matmul M dimension.
    if num_cores > 1 and B // bt < num_cores:
        cands = [d for d in fit if B // d >= num_cores]
        if cands:
            cand = max(cands)
            if cand * tb >= 128 or B * t_pad < 256:
                bt = cand
    return bt, tb, t_pad, n_t, vmem_limit


# ---------------------------------------------------------------------------
# Kernels
# ---------------------------------------------------------------------------

def _attention_scores(x, wk_ref, bk_ref, wv_ref):
    """(bt, tt, D) f32 -> (bt, tt, H) pre-softmax scores.

    Both projections run as one flattened (bt*tt, .) MXU matmul chain; tt is
    always a multiple of 8, so the flatten / unflatten are layout-preserving
    views rather than relayout copies.
    """
    bt, tt, d = x.shape
    x2 = x.reshape(bt * tt, d)
    k = jnp.dot(x2, wk_ref[...], preferred_element_type=jnp.float32)
    k = jnp.tanh(k + bk_ref[...])
    s = jnp.dot(k, wv_ref[...], preferred_element_type=jnp.float32)
    return s.reshape(bt, tt, -1)


def _make_full_t_kernel(t_valid):
    """Common path: the whole (padded) sequence is resident per grid step."""

    def kernel(x_ref, wk_ref, bk_ref, wv_ref, out_ref):
        bt, tt, _ = x_ref.shape
        x = x_ref[...].astype(jnp.float32)                    # (bt, tt, D)
        s = _attention_scores(x, wk_ref, bk_ref, wv_ref)      # (bt, tt, H)
        if t_valid < tt:  # static: padded tail rows get zero attention weight
            rows = lax.broadcasted_iota(jnp.int32, s.shape, 1)
            s = jnp.where(rows < t_valid, s, -jnp.inf)

        # Softmax over T.  Only the head-sum of the normalized attention is
        # ever needed, so it collapses to one scalar weight per timestep.
        m = jnp.max(s, axis=1, keepdims=True)                 # (bt, 1, H)
        p = jnp.exp(s - m)                                    # (bt, tt, H)
        inv = 1.0 / jnp.sum(p, axis=1, keepdims=True)         # exact; EUP slack
        w = jnp.sum(p * inv, axis=2, keepdims=True)           # (bt, tt, 1)

        # Weighted first/second moments on the VPU: no M=1 MXU matmuls, and wx
        # is the only x-sized intermediate (no standalone x*x temporary).
        wx = w * x                                            # (bt, tt, D)
        mean = jnp.sum(wx, axis=1)                            # (bt, D)
        msq = jnp.sum(wx * x, axis=1)                         # (bt, D)
        stdv = jnp.sqrt(jnp.maximum(msq - mean * mean, 1e-9))

        # Lane-dense stores: full-width D rows at sublane offsets 0 / 1.
        out_ref[:, 0:1, :] = mean[:, None, :]
        out_ref[:, 1:2, :] = stdv[:, None, :]

    return kernel


def _make_tiled_t_kernel(t_valid):
    """Long-sequence path: T tiled on an 'arbitrary' grid axis, with
    online-softmax accumulation of per-head max / denominator and of the
    unnormalized per-head first/second moments."""

    def kernel(x_ref, wk_ref, bk_ref, wv_ref, out_ref,
               m_ref, l_ref, acc1_ref, acc2_ref):
        bt, tt, _ = x_ref.shape
        kt = pl.program_id(1)

        @pl.when(kt == 0)
        def _():
            m_ref[...] = jnp.full(m_ref.shape, -jnp.inf, m_ref.dtype)
            l_ref[...] = jnp.zeros(l_ref.shape, l_ref.dtype)
            acc1_ref[...] = jnp.zeros(acc1_ref.shape, acc1_ref.dtype)
            acc2_ref[...] = jnp.zeros(acc2_ref.shape, acc2_ref.dtype)

        x = x_ref[...].astype(jnp.float32)                    # (bt, tt, D)
        s = _attention_scores(x, wk_ref, bk_ref, wv_ref)      # (bt, tt, H)
        if t_valid % tt:  # static: only the last tile carries padded rows
            rows = lax.broadcasted_iota(jnp.int32, s.shape, 1) + kt * tt
            s = jnp.where(rows < t_valid, s, -jnp.inf)

        m_old = m_ref[...]                                    # (bt, 1, H)
        m_new = jnp.maximum(m_old, jnp.max(s, axis=1, keepdims=True))
        alpha = jnp.exp(m_old - m_new)                        # rescale factor
        p = jnp.exp(s - m_new)                                # (bt, tt, H)

        l_ref[...] = alpha * l_ref[...] + jnp.sum(p, axis=1, keepdims=True)
        a_h = alpha.reshape(alpha.shape[0], alpha.shape[2], 1)   # (bt, H, 1)
        acc1_ref[...] = a_h * acc1_ref[...] + jnp.einsum(
            "bth,btd->bhd", p, x, preferred_element_type=jnp.float32)
        acc2_ref[...] = a_h * acc2_ref[...] + jnp.einsum(
            "bth,btd->bhd", p, x * x, preferred_element_type=jnp.float32)
        m_ref[...] = m_new

        @pl.when(kt == pl.num_programs(1) - 1)
        def _():
            l = l_ref[...]
            inv_l = (1.0 / l).reshape(l.shape[0], l.shape[2], 1)  # (bt, H, 1)
            mean = jnp.sum(acc1_ref[...] * inv_l, axis=1)         # (bt, D)
            msq = jnp.sum(acc2_ref[...] * inv_l, axis=1)
            stdv = jnp.sqrt(jnp.maximum(msq - mean * mean, 1e-9))
            out_ref[:, 0:1, :] = mean[:, None, :]
            out_ref[:, 1:2, :] = stdv[:, None, :]

    return kernel


# ---------------------------------------------------------------------------
# Wrapper
# ---------------------------------------------------------------------------

def attention_statistic_pooling(x, wk_t, bk, wv_t, *, t_block=None):
    """x: (B, T, D); wk_t: (D, A) = key.weight.T; bk: (A,) = key.bias;
    wv_t: (A, H) = value.weight.T.  Returns (B, 2*D) = concat([mean, stdv], 1).

    x may be float32 or bfloat16 (bf16 halves HBM traffic; all softmax and
    variance math runs in float32 inside the kernel).
    """
    B, T, D = x.shape
    A = wk_t.shape[1]
    H = wv_t.shape[1]
    bk2 = bk.reshape(1, A).astype(jnp.float32)

    bt, tb, t_pad, n_t, vmem_limit = _pick_tiling(
        B, T, D, jnp.dtype(x.dtype).itemsize, t_block)

    xp = x if t_pad == T else jnp.pad(x, ((0, 0), (0, t_pad - T), (0, 0)))

    # Lane-dense (B, 2, D) output (mean in row 0, stdv in row 1); the reshape
    # to (B, 2D) below is exactly torch.cat([mean, stdv], dim=1).
    out_shape = jax.ShapeDtypeStruct((B, 2, D), jnp.float32)
    compiler_params = pltpu.CompilerParams(
        dimension_semantics=("parallel",) if n_t == 1 else ("parallel", "arbitrary"),
        vmem_limit_bytes=vmem_limit,
    )

    if n_t == 1:
        out3 = pl.pallas_call(
            _make_full_t_kernel(T),
            out_shape=out_shape,
            grid_spec=pltpu.PrefetchScalarGridSpec(
                num_scalar_prefetch=0,
                grid=(B // bt,),
                in_specs=[
                    pl.BlockSpec((bt, t_pad, D), lambda b: (b, 0, 0)),
                    pl.BlockSpec((D, A), lambda b: (0, 0)),
                    pl.BlockSpec((1, A), lambda b: (0, 0)),
                    pl.BlockSpec((A, H), lambda b: (0, 0)),
                ],
                out_specs=pl.BlockSpec((bt, 2, D), lambda b: (b, 0, 0)),
            ),
            compiler_params=compiler_params,
        )(xp, wk_t, bk2, wv_t)
    else:
        out3 = pl.pallas_call(
            _make_tiled_t_kernel(T),
            out_shape=out_shape,
            grid_spec=pltpu.PrefetchScalarGridSpec(
                num_scalar_prefetch=0,
                grid=(B // bt, n_t),
                in_specs=[
                    pl.BlockSpec((bt, tb, D), lambda b, kt: (b, kt, 0)),
                    pl.BlockSpec((D, A), lambda b, kt: (0, 0)),
                    pl.BlockSpec((1, A), lambda b, kt: (0, 0)),
                    pl.BlockSpec((A, H), lambda b, kt: (0, 0)),
                ],
                out_specs=pl.BlockSpec((bt, 2, D), lambda b, kt: (b, 0, 0)),
                scratch_shapes=[
                    pltpu.VMEM((bt, 1, H), jnp.float32),   # running max
                    pltpu.VMEM((bt, 1, H), jnp.float32),   # running denominator
                    pltpu.VMEM((bt, H, D), jnp.float32),   # unnormalized E[x]
                    pltpu.VMEM((bt, H, D), jnp.float32),   # unnormalized E[x^2]
                ],
            ),
            compiler_params=compiler_params,
        )(xp, wk_t, bk2, wv_t)

    return out3.reshape(B, 2 * D)


def _reference(x, wk_t, bk, wv_t):
    """Pure-JAX mirror of the PyTorch forward (correctness check)."""
    s = jnp.tanh(jnp.einsum("btd,da->bta", x, wk_t) + bk)        # B,T,A
    s = jnp.einsum("bta,ah->bth", s, wv_t)                       # B,T,H
    attn = jax.nn.softmax(s, axis=1)                             # softmax over T
    attn_t = jnp.swapaxes(attn, -1, -2)                          # B,H,T
    mean = jnp.sum(jnp.einsum("bht,btd->bhd", attn_t, x), axis=1)
    resid = jnp.sum(jnp.einsum("bht,btd->bhd", attn_t, x * x), axis=1) - mean ** 2
    stdv = jnp.sqrt(jnp.maximum(resid, 1e-9))                    # == clamp(min=1e-9)
    return jnp.concatenate([mean, stdv], axis=1)


if __name__ == "__main__":
    # Small shapes consistent with the module: B=2, T=8, hidden D=32,
    # attention_size A=16, head_num H=4.
    B, T, D, A, H = 2, 8, 32, 16, 4

    key = jax.random.PRNGKey(0)
    kx, kw1, kb1, kw2, kx2, kx3 = jax.random.split(key, 6)

    x = jax.random.normal(kx, (B, T, D), dtype=jnp.float32)
    # nn.Linear(hidden, attention_size) weight is (A, D); stored transposed.
    wk_t = jax.random.normal(kw1, (D, A), dtype=jnp.float32) * 0.1
    bk = jax.random.normal(kb1, (A,), dtype=jnp.float32) * 0.1
    # nn.Linear(attention_size, head_num, bias=False) weight (H, A); transposed.
    wv_t = jax.random.normal(kw2, (A, H), dtype=jnp.float32) * 0.1

    # 1) Common path: full-T block, lane-dense (B, 2, D) output.
    out = jax.block_until_ready(attention_statistic_pooling(x, wk_t, bk, wv_t))
    ref = _reference(x, wk_t, bk, wv_t)
    assert out.shape == (B, 2 * D)
    assert jnp.allclose(out, ref, atol=1e-4, rtol=1e-4), float(
        jnp.max(jnp.abs(out - ref)))

    # 2) Long-sequence path: force T tiling (online-softmax accumulation).
    x2 = jax.random.normal(kx2, (B, 32, D), dtype=jnp.float32)
    out2 = jax.block_until_ready(
        attention_statistic_pooling(x2, wk_t, bk, wv_t, t_block=8))
    ref2 = _reference(x2, wk_t, bk, wv_t)
    assert jnp.allclose(out2, ref2, atol=1e-4, rtol=1e-4), float(
        jnp.max(jnp.abs(out2 - ref2)))

    # 3) T not a multiple of 8: exercises the pad + in-kernel masking path.
    x3 = jax.random.normal(kx3, (B, 12, D), dtype=jnp.float32)
    out3 = jax.block_until_ready(attention_statistic_pooling(x3, wk_t, bk, wv_t))
    ref3 = _reference(x3, wk_t, bk, wv_t)
    assert jnp.allclose(out3, ref3, atol=1e-4, rtol=1e-4), float(
        jnp.max(jnp.abs(out3 - ref3)))

    print("KERNEL_OK")
</pallas_src>

<mosaic_0001>
module attributes {stable_mosaic.version = 11 : i64} {
  func.func @kernel(%arg0: i32, %arg1: memref<2x8x32xf32, #tpu.memory_space<vmem>>, %arg2: memref<32x16xf32, #tpu.memory_space<vmem>>, %arg3: memref<1x16xf32, #tpu.memory_space<vmem>>, %arg4: memref<16x4xf32, #tpu.memory_space<vmem>>, %arg5: memref<2x2x32xf32, #tpu.memory_space<vmem>>) attributes {dimension_semantics = [#tpu.dimension_semantics<parallel>], iteration_bounds = array<i64: 1>, scalar_prefetch = 0 : i64, scratch_operands = 0 : i64, tpu.core_type = #tpu.core_type<tc>, window_params = [{transform_indices = @transform_0, window_bounds = array<i64: 2, 8, 32>}, {pipeline_mode = #tpu.pipeline_mode<synchronous>, transform_indices = @transform_1, window_bounds = array<i64: 32, 16>}, {pipeline_mode = #tpu.pipeline_mode<synchronous>, transform_indices = @transform_2, window_bounds = array<i64: 1, 16>}, {pipeline_mode = #tpu.pipeline_mode<synchronous>, transform_indices = @transform_3, window_bounds = array<i64: 16, 4>}, {transform_indices = @transform_4, window_bounds = array<i64: 2, 2, 32>}]} {
    %c0 = arith.constant 0 : index
    %c0_0 = arith.constant 0 : index
    %c0_1 = arith.constant 0 : index
    %0 = vector.load %arg1[%c0, %c0_0, %c0_1] : memref<2x8x32xf32, #tpu.memory_space<vmem>>, vector<2x8x32xf32>
    %1 = vector.shape_cast %0 : vector<2x8x32xf32> to vector<16x32xf32>
    %c0_2 = arith.constant 0 : index
    %c0_3 = arith.constant 0 : index
    %2 = vector.load %arg2[%c0_2, %c0_3] : memref<32x16xf32, #tpu.memory_space<vmem>>, vector<32x16xf32>
    %cst = arith.constant dense<0.000000e+00> : vector<16x16xf32>
    %3 = tpu.matmul %1, %2, %cst {dimension_numbers = #tpu.dot_dimension_numbers<[1], [0], [0], [1], [0, 0, 1, 1], [], []>} : vector<16x32xf32>, vector<32x16xf32>, vector<16x16xf32> -> vector<16x16xf32>
    %c0_4 = arith.constant 0 : index
    %c0_5 = arith.constant 0 : index
    %4 = vector.load %arg3[%c0_4, %c0_5] : memref<1x16xf32, #tpu.memory_space<vmem>>, vector<1x16xf32>
    %5 = vector.broadcast %4 : vector<1x16xf32> to vector<16x16xf32>
    %6 = arith.addf %3, %5 : vector<16x16xf32>
    %7 = math.tanh %6 : vector<16x16xf32>
    %c0_6 = arith.constant 0 : index
    %c0_7 = arith.constant 0 : index
    %8 = vector.load %arg4[%c0_6, %c0_7] : memref<16x4xf32, #tpu.memory_space<vmem>>, vector<16x4xf32>
    %cst_8 = arith.constant dense<0.000000e+00> : vector<16x4xf32>
    %9 = tpu.matmul %7, %8, %cst_8 {dimension_numbers = #tpu.dot_dimension_numbers<[1], [0], [0], [1], [0, 0, 1, 1], [], []>} : vector<16x16xf32>, vector<16x4xf32>, vector<16x4xf32> -> vector<16x4xf32>
    %10 = vector.shape_cast %9 : vector<16x4xf32> to vector<2x8x4xf32>
    %cst_9 = arith.constant dense<0xFF800000> : vector<2x4xf32>
    %11 = vector.multi_reduction <maximumf>, %10, %cst_9 [1] : vector<2x8x4xf32> to vector<2x4xf32>
    %12 = vector.shape_cast %11 : vector<2x4xf32> to vector<2x1x4xf32>
    %13 = vector.broadcast %12 : vector<2x1x4xf32> to vector<2x8x4xf32>
    %14 = arith.subf %10, %13 : vector<2x8x4xf32>
    %15 = math.exp %14 : vector<2x8x4xf32>
    %cst_10 = arith.constant dense<0.000000e+00> : vector<2x4xf32>
    %16 = vector.multi_reduction <add>, %15, %cst_10 [1] : vector<2x8x4xf32> to vector<2x4xf32>
    %17 = vector.shape_cast %16 : vector<2x4xf32> to vector<2x1x4xf32>
    %cst_11 = arith.constant 1.000000e+00 : f32
    %18 = vector.broadcast %cst_11 : f32 to vector<2x1x4xf32>
    %19 = arith.divf %18, %17 : vector<2x1x4xf32>
    %20 = vector.broadcast %19 : vector<2x1x4xf32> to vector<2x8x4xf32>
    %21 = arith.mulf %15, %20 : vector<2x8x4xf32>
    %cst_12 = arith.constant dense<0.000000e+00> : vector<2x8xf32>
    %22 = vector.multi_reduction <add>, %21, %cst_12 [2] : vector<2x8x4xf32> to vector<2x8xf32>
    %23 = vector.shape_cast %22 : vector<2x8xf32> to vector<2x8x1xf32>
    %24 = vector.broadcast %23 : vector<2x8x1xf32> to vector<2x8x32xf32>
    %25 = arith.mulf %24, %0 : vector<2x8x32xf32>
    %cst_13 = arith.constant dense<0.000000e+00> : vector<2x32xf32>
    %26 = vector.multi_reduction <add>, %25, %cst_13 [1] : vector<2x8x32xf32> to vector<2x32xf32>
    %27 = arith.mulf %25, %0 : vector<2x8x32xf32>
    %cst_14 = arith.constant dense<0.000000e+00> : vector<2x32xf32>
    %28 = vector.multi_reduction <add>, %27, %cst_14 [1] : vector<2x8x32xf32> to vector<2x32xf32>
    %29 = arith.mulf %26, %26 : vector<2x32xf32>
    %30 = arith.subf %28, %29 : vector<2x32xf32>
    %cst_15 = arith.constant 9.99999971E-10 : f32
    %31 = vector.broadcast %cst_15 : f32 to vector<2x32xf32>
    %32 = arith.maximumf %30, %31 : vector<2x32xf32>
    %33 = math.sqrt %32 : vector<2x32xf32>
    %34 = vector.shape_cast %26 : vector<2x32xf32> to vector<2x1x32xf32>
    %c0_16 = arith.constant 0 : index
    %c0_17 = arith.constant 0 : index
    %c0_18 = arith.constant 0 : index
    %35 = vector.load %arg5[%c0_16, %c0_17, %c0_18] : memref<2x2x32xf32, #tpu.memory_space<vmem>>, vector<2x1x32xf32>
    tpu.vector_store %arg5[%c0_16, %c0_17, %c0_18], %34 {strides = array<i32>} : memref<2x2x32xf32, #tpu.memory_space<vmem>>, vector<2x1x32xf32>,
    %36 = vector.shape_cast %33 : vector<2x32xf32> to vector<2x1x32xf32>
    %c0_19 = arith.constant 0 : index
    %c1 = arith.constant 1 : index
    %c0_20 = arith.constant 0 : index
    %37 = vector.load %arg5[%c0_19, %c1, %c0_20] : memref<2x2x32xf32, #tpu.memory_space<vmem>>, vector<2x1x32xf32>
    tpu.vector_store %arg5[%c0_19, %c1, %c0_20], %36 {strides = array<i32>} : memref<2x2x32xf32, #tpu.memory_space<vmem>>, vector<2x1x32xf32>,
    return
  }
  func.func @transform_0(%arg0: i32) -> (i32, i32, i32) {
    %c0_i32 = arith.constant 0 : i32
    %c0_i32_0 = arith.constant 0 : i32
    %c0_i32_1 = arith.constant 0 : i32
    return %arg0, %c0_i32, %c0_i32_0 : i32, i32, i32
  }
  func.func @transform_1(%arg0: i32) -> (i32, i32) {
    %c0_i32 = arith.constant 0 : i32
    %c0_i32_0 = arith.constant 0 : i32
    %c0_i32_1 = arith.constant 0 : i32
    return %c0_i32, %c0_i32_0 : i32, i32
  }
  func.func @transform_2(%arg0: i32) -> (i32, i32) {
    %c0_i32 = arith.constant 0 : i32
    %c0_i32_0 = arith.constant 0 : i32
    %c0_i32_1 = arith.constant 0 : i32
    return %c0_i32, %c0_i32_0 : i32, i32
  }
  func.func @transform_3(%arg0: i32) -> (i32, i32) {
    %c0_i32 = arith.constant 0 : i32
    %c0_i32_0 = arith.constant 0 : i32
    %c0_i32_1 = arith.constant 0 : i32
    return %c0_i32, %c0_i32_0 : i32, i32
  }
  func.func @transform_4(%arg0: i32) -> (i32, i32, i32) {
    %c0_i32 = arith.constant 0 : i32
    %c0_i32_0 = arith.constant 0 : i32
    %c0_i32_1 = arith.constant 0 : i32
    return %arg0, %c0_i32, %c0_i32_0 : i32, i32, i32
  }
}

</mosaic_0001>

<bundles_post_ra>
// kernel: tpu_custom_call.1
= control target key start
LH: loop header
LB: loop body
LE: loop exit
PB: predicated region body
PF: predicated region fallthrough
CT: control target
= control target key end

     0   :  { %vm31_vm0 = vcmask 261120   ;;  %s500_s0 = inlined_call_operand.vmem [shape: f32[2,8,32], index: 0, kind: input, shape index: {}]   ;;  %s501_s1 = inlined_call_operand.vmem [shape: f32[32,16], index: 1, kind: input, shape index: {}]   ;;  %s502_s2 = inlined_call_operand.vmem [shape: f32[1,16], index: 2, kind: input, shape index: {}]   ;;  %s503_s3 = inlined_call_operand.vmem [shape: f32[16,4], index: 3, kind: input, shape index: {}]   ;;  %s504_s4 = inlined_call_operand.hbm [shape: f32[2,2,32], index: 4, kind: output, shape index: {}]  }
   0x1   :  { %v20_v0 = vld [vmem:[%s501_s1] sm:$0xff]  ;;  %v21_v1 = vld [vmem:[%s501_s1 + $0x8] sm:$0xff]  ;;  %v22_v2 = vld [vmem:[%s501_s1 + $0x10] sm:$0xff] }
   0x2   :  { %v352_v3 = vpack.c.bf16 %v21_v1, %v20_v0  ;;  %v23_v4 = vld [vmem:[%s501_s1 + $0x18] sm:$0xff]  ;;  %v450_v5 = vld [vmem:[%s500_s0] sm:$0xff] }
   0x3   :  { %v356_v6 = vpack.c.bf16 %v23_v4, %v22_v2  ;;  %342 = vmatprep.mubr.msk.f32.mxu0 %vm31_vm0, %v450_v5 }
   0x4   :  { %9 = vsyncpa [#allocation3], 0  ;;  %353 = vmatprep.subr.bf16.mxu0 %v352_v3  ;;  %v457_v7 = vld [vmem:[%s500_s0 + $0x8] sm:$0xff]  ;;  %v115_v8 = vld [vmem:[%s503_s3] sm:$0xff]  ;;  %vm117_vm1 = vcmask 130048   ;;  %vm199_vm2 = vcmask 31744  }
   0x5   :  { %355 = vmatpush3.bf16.msra.mxu0 %v352_v3  ;;  %v116_v9 = vld [vmem:[%s503_s3 + $0x8] sm:$0xff]  ;;  %v319_v11 = vld [vmem:[%s502_s2] ss:$0 sm:$0xff]  ;;  %vm298_vm3 = vcmask 253952   ;;  %s407_s0 = smov [#allocation2]  }
   0x6   :  { %357 = vmatprep.subr.bf16.mxu0 %v356_v6  ;;  %v360_v10 = vpack.c.bf16 %v116_v9, %v115_v8  ;;  %s308_s2 = sshll.u32 %s407_s0, 4  ;;  %s309_s2 = int_to_ptr.vmem [resolvable:$true] %s308_s2 }
   0x7   :  { %s383_s3 = scalar_lea.vmem %s309_s2, 64  ;;  %p388_p1 = scmp.lt.s32.totalorder %s309_s2, %s309_s2 }
   0x8   :  { %361 = vmatprep.subr.bf16.mxu1 %v360_v10  ;;  %p384_p0 = scmp.ne.s32.totalorder %s309_s2, %s383_s3  ;;  %p389_p2 = scmp.lt.s32.totalorder %s383_s3, %s383_s3 }
   0x9   :  { %359 = vmatpush3.bf16.msra.mxu0 %v356_v6  ;;  %363 = vmatpush3.bf16.msra.mxu1 %v360_v10 }
   0xa   :  { %p390_p3 = por %p389_p2, %p388_p1 }
   0xc   :  { %343 = vmatmul.mubr.msk.f32.vlgmr.msra.gmra.mrb[0].mxu0 %vm31_vm0, %v457_v7  ;;  %p391_p4 = pnand %p390_p3, %p384_p0 }
  0xdf   :  { %v344_v12 = vpop.f32.mrb[0].mxu0 }
  0xe0   :  { %v110_v13 = vadd.f32 %v344_v12, %v319_v11  ;;  %v104_v14 = vpop.f32.mrb[1].mxu0 }
  0xe1   :  { %v105_v15 = vadd.f32 %v319_v11, %v104_v14 }
  0xe3   :  { %367 = vtanh.f32 %v105_v15 }
  0xe4   :  { %369 = vtanh.f32 %v110_v13 }
  0xed   :  { %v368_v16 = vpop.eup %367 }
  0xee   :  { %v370_v17 = vpop.eup %369  ;;  %349 = vmatprep.mubr.msk.f32.mxu1 %vm117_vm1, %v368_v16 }
  0xef   :  { %350 = vmatmul.mubr.msk.f32.vlgmr.msra.gmra.mrb[0].mxu1 %vm117_vm1, %v370_v17 }
 0x1c2   :  { %v351_v18 = vpop.f32.mrb[0].mxu1 }
 0x1c3   :  { %v207_v19 = vsel %vm199_vm2, %v351_v18, -inf  ;;  %v190_v20 = vpop.f32.mrb[1].mxu1 }
 0x1c4   :  { %v208_v21 = vrot.slane %v207_v19, 4  ;;  %v200_v22 = vsel %vm199_vm2, %v190_v20, -inf }
 0x1c5   :  { %v201_v23 = vrot.slane %v200_v22, 4 }
 0x1c6   :  { %v209_v24 = vmax.f32 %v207_v19, %v208_v21 }
 0x1c7   :  { %v202_v25 = vmax.f32 %v200_v22, %v201_v23 }
 0x1c8   :  { %v210_v26 = vrot.slane %v209_v24, 2 }
 0x1c9   :  { %v203_v27 = vrot.slane %v202_v25, 2 }
 0x1ca   :  { %v211_v28 = vmax.f32 %v209_v24, %v210_v26 }
 0x1cb   :  { %v204_v29 = vmax.f32 %v202_v25, %v203_v27 }
 0x1cc   :  { %v212_v30 = vrot.slane %v211_v28, 1 }
 0x1cd   :  { %v205_v31 = vrot.slane %v204_v29, 1 }
 0x1ce   :  { %v213_v32 = vmax.f32 %v211_v28, %v212_v30 }
 0x1cf   :  { %v206_v33 = vmax.f32 %v204_v29, %v205_v31 }
 0x1d0   :  { %v215_v34 = vsub.f32 %v351_v18, %v213_v32 }
 0x1d1   :  { %v214_v35 = vsub.f32 %v190_v20, %v206_v33 }
 0x1d2   :  { %v218_v36 = vmul.f32 1.442695, %v215_v34 }
 0x1d3   :  { %v216_v37 = vmul.f32 1.442695, %v214_v35 }
 0x1d4   :  { %371 = vpow2.f32 %v218_v36 }
 0x1d5   :  { %373 = vpow2.f32 %v216_v37 }
 0x1de   :  { %v372_v38 = vpop.eup %371 }
 0x1df   :  { %v374_v39 = vpop.eup %373  ;;  %v227_v40 = vsel %vm199_vm2, %v372_v38, 0.0 }
 0x1e0   :  { %v228_v41 = vrot.slane %v227_v40, 4  ;;  %v220_v42 = vsel %vm199_vm2, %v374_v39, 0.0 }
 0x1e1   :  { %v221_v43 = vrot.slane %v220_v42, 4 }
 0x1e2   :  { %v229_v44 = vadd.f32 %v228_v41, %v227_v40 }
 0x1e3   :  { %v222_v45 = vadd.f32 %v221_v43, %v220_v42 }
 0x1e4   :  { %v230_v46 = vrot.slane %v229_v44, 2 }
 0x1e5   :  { %v223_v47 = vrot.slane %v222_v45, 2 }
 0x1e6   :  { %v231_v48 = vadd.f32 %v230_v46, %v229_v44 }
 0x1e7   :  { %v224_v49 = vadd.f32 %v223_v47, %v222_v45 }
 0x1e8   :  { %v232_v50 = vrot.slane %v231_v48, 1 }
 0x1e9   :  { %v225_v51 = vrot.slane %v224_v49, 1 }
 0x1ea   :  { %v233_v52 = vadd.f32 %v232_v50, %v231_v48 }
 0x1eb   :  { %v226_v53 = vadd.f32 %v225_v51, %v224_v49 }
 0x1ec   :  { %375 = vrcp.f32 %v233_v52 }
 0x1ed   :  { %377 = vrcp.f32 %v226_v53 }
 0x1f6   :  { %v376_v54 = vpop.eup %375 }
 0x1f7   :  { %v378_v55 = vpop.eup %377  ;;  %v239_v58 = vmul.f32 %v376_v54, %v372_v38 }
 0x1f8   :  { %v238_v56 = vmul.f32 %v378_v55, %v374_v39 }
 0x1f9   :  { %v243_v59 = vsel %vm199_vm2, %v239_v58, 0.0 }
 0x1fa   :  { %v240_v57 = vsel %vm199_vm2, %v238_v56, 0.0 }
 0x1fb   :  { %241 = vadd.xlane.f32.xlu0 %v240_v57 }
 0x1ff   :  { %244 = vadd.xlane.f32.xlu0 %v243_v59 }
 0x288   :  { %v242_v60 = vpop.xlane.xlu0 %241 }
 0x289   :  { %v246_v61 = vmul.f32 %v242_v60, %v450_v5 }
 0x28b   :  { %v248_v62 = vsel %vm31_vm0, %v246_v61, 0.0  ;;  %v262_v63 = vmul.f32 %v246_v61, %v450_v5 }
 0x28c   :  { %v249_v0 = vrot.slane %v248_v62, 4  ;;  %v245_v1 = vpop.xlane.xlu0 %244 }
 0x28d   :  { %v264_v2 = vsel %vm31_vm0, %v262_v63, 0.0  ;;  %v247_v3 = vmul.f32 %v245_v1, %v457_v7 }
 0x28e   :  { %v250_v4 = vadd.f32 %v249_v0, %v248_v62  ;;  %v265_v6 = vrot.slane %v264_v2, 4 }
 0x28f   :  { %v255_v8 = vsel %vm31_vm0, %v247_v3, 0.0  ;;  %v263_v9 = vmul.f32 %v247_v3, %v457_v7 }
 0x290   :  { %v251_v10 = vrot.slane %v250_v4, 2  ;;  %v266_v11 = vadd.f32 %v265_v6, %v264_v2  ;;  %v256_v12 = vrot.slane %v255_v8, 4 }
 0x291   :  { %v271_v13 = vsel %vm31_vm0, %v263_v9, 0.0 }
 0x292   :  { %v252_v14 = vadd.f32 %v251_v10, %v250_v4  ;;  %v267_v15 = vrot.slane %v266_v11, 2  ;;  %v257_v5 = vadd.f32 %v256_v12, %v255_v8  ;;  %v272_v16 = vrot.slane %v271_v13, 4 }
 0x294   :  { %v253_v17 = vrot.slane %v252_v14, 1  ;;  %v268_v18 = vadd.f32 %v267_v15, %v266_v11  ;;  %v258_v19 = vrot.slane %v257_v5, 2  ;;  %v273_v20 = vadd.f32 %v272_v16, %v271_v13 }
 0x296   :  { %v254_v21 = vadd.f32 %v253_v17, %v252_v14  ;;  %v269_v22 = vrot.slane %v268_v18, 1  ;;  %v259_v23 = vadd.f32 %v258_v19, %v257_v5  ;;  %v274_v24 = vrot.slane %v273_v20, 2 }
 0x298   :  { %v270_v25 = vadd.f32 %v269_v22, %v268_v18  ;;  %v278_v7 = vmul.f32 %v254_v21, %v254_v21  ;;  %299 = vst.msk [vmem:[#allocation2] sm:$0x1] %vm298_vm3, %v254_v21  ;;  %v260_v26 = vrot.slane %v259_v23, 1  ;;  %v275_v27 = vadd.f32 %v274_v24, %v273_v20 }
 0x29a   :  { %v280_v28 = vsub.f32 %v270_v25, %v278_v7  ;;  %v261_v29 = vadd.f32 %v260_v26, %v259_v23  ;;  %v276_v30 = vrot.slane %v275_v27, 1 }
 0x29c   :  { %v282_v31 = vmax.f32 %v280_v28, 1e-09  ;;  %v277_v32 = vadd.f32 %v276_v30, %v275_v27  ;;  %v279_v33 = vmul.f32 %v261_v29, %v261_v29  ;;  %300 = vst.msk [vmem:[#allocation2 + $0x2] sm:$0x1] %vm298_vm3, %v261_v29 }
 0x29e   :  { %379 = vrsqrt.f32 %v282_v31  ;;  %v281_v34 = vsub.f32 %v277_v32, %v279_v33  ;;  %vm286_vm4 = vcmp.eq.f32.partialorder %v282_v31, inf  ;;  %v289_v38 = vand.u32 2147483648, %v282_v31 }
 0x29f   :  { %vm288_vm5 = vcmp.eq.f32.partialorder %v282_v31, 0.0 }
 0x2a0   :  { %v283_v35 = vmax.f32 %v281_v34, 1e-09 }
 0x2a2   :  { %381 = vrsqrt.f32 %v283_v35  ;;  %vm293_vm6 = vcmp.eq.f32.partialorder %v283_v35, inf  ;;  %v296_v43 = vand.u32 2147483648, %v283_v35  ;;  %vm295_vm7 = vcmp.eq.f32.partialorder %v283_v35, 0.0 }
 0x2a8   :  { %v380_v36 = vpop.eup %379 }
 0x2a9   :  { %v285_v37 = vmul.f32 %v380_v36, %v282_v31 }
 0x2ab   :  { %v287_v39 = vsel %vm286_vm4, %v282_v31, %v285_v37 }
 0x2ac   :  { %v382_v40 = vpop.eup %381  ;;  %v290_v41 = vsel %vm288_vm5, %v289_v38, %v287_v39 }
 0x2ad   :  { %v292_v42 = vmul.f32 %v382_v40, %v283_v35  ;;  %301 = vst.msk [vmem:[#allocation2 + $0x1] sm:$0x1] %vm298_vm3, %v290_v41 }
 0x2af   :  { %v294_v44 = vsel %vm293_vm6, %v283_v35, %v292_v42 }
 0x2b0   :  { %v297_v45 = vsel %vm295_vm7, %v296_v43, %v294_v44 }
 0x2b1   :  { %302 = vst.msk [vmem:[#allocation2 + $0x3] sm:$0x1] %vm298_vm3, %v297_v45 }
 0x2b2   :  { %394 = shalt.err (!%p391_p4)
}
 0x2b3   :  { %s395_s8 = scalar_lea.hbm %s504_s4, 64 }
 0x2b4   :  { %p396_p5 = scmp.ne.s32.totalorder %s504_s4, %s395_s8  ;;  %p399_p6 = scmp.lt.u32.totalorder %s395_s8, %s504_s4 }
 0x2b6   :  { %p401_p7 = pnand %p399_p6, %p396_p5 }
 0x2b8   :  { %404 = shalt.err (!%p401_p7)
}
 0x2b9   :  { %s408_s13 = smov 32   ;;  %s409_s14 = smov 2  }
 0x2ba   :  { %314 = dma.vmem_to_hbm [thread:$0]  %s309_s2, 64, %s504_s4, [#allocation3], %s408_s13, %s408_s13, %s409_s14  }
 0x2bb   :  { %405 = dma.done.wait [#allocation3], 64  }
 0x2bc   :  { %406 = vsyncadd [#allocation3], 4294967232 }
 0x2bd   :  { %318 = vsyncpa [#allocation3], 1 }

</bundles_post_ra>
